<compile_context>
chip_gen: v5e
topology: v5e:2x2
jax: 0.10.0
libtpu: 0.0.40
codegen_flags: <defaults>
</compile_context>

<pallas_src>
import functools
import math

import jax
import jax.numpy as jnp
from jax import lax
from jax.experimental import pallas as pl
from jax.experimental.pallas import tpu as pltpu


# ----------------------------- Pallas kernel ---------------------------------
def _dense_conv_kernel(x_ref, w_ref, b_ref, a_ref, m_ref, o_ref, *,
                       cin, cout, k, dil, W, HW, pad_flat):
    """Fused same-size conv (k*k shifted matmuls) + bias + ReLU + concat(x, .).

    x_ref : (1, cin, L) f32   flat halo-padded activations, L = HW + 2*pad_flat
    w_ref : (k*k, cout, cin)  f32 per-tap conv weight, tap order (dy, dx)
    b_ref : (cout, 1) f32     bias (zeros if disabled)
    a_ref : (1, k*k, 1, cin)  f32 KA attention scale (ones if disabled)
    m_ref : (k, 1, HW) f32    per-dx masks killing row-wrap positions
    o_ref : (1, cin+cout, HW) f32  [x ; ReLU(conv + bias)]
    """
    xall = x_ref[0]                                        # (cin, L) f32, VMEM-resident

    # Fused concat: pass the original activations straight through (exact f32).
    o_ref[0, 0:cin, :] = xall[:, pad_flat:pad_flat + HW]

    acc = jnp.zeros((cout, HW), jnp.float32)
    for dy in range(k):
        for dx in range(k):
            t = dy * k + dx
            off = (dy * W + dx) * dil                      # flat shift of this tap
            # Shifted slab; mask zeroes positions where the flat shift crossed a
            # row boundary (W-edge padding).  H-edge padding comes from the halo.
            slab = (xall[:, off:off + HW] * m_ref[dx]).astype(jnp.bfloat16)
            # Per-tap weight, KA-modulated in-kernel (free VALU work under MXU).
            wt = (w_ref[t] * a_ref[0, t]).astype(jnp.bfloat16)   # (cout, cin)
            acc = acc + jnp.dot(wt, slab, preferred_element_type=jnp.float32)

    # Fused epilogue: bias + ReLU, lane-dense (HW) store.
    o_ref[0, cin:, :] = jnp.maximum(acc + b_ref[...], 0.0)


# ------------------------------ JAX glue --------------------------------------
def _adaptive_avg_pool2d(x, out_size):
    """PyTorch-style adaptive_avg_pool2d to (out_size, out_size). x: (B, C, H, W)."""
    B, C, H, W = x.shape

    def bins(n_in, n_out):
        return [(int(math.floor(i * n_in / n_out)), int(math.ceil((i + 1) * n_in / n_out)))
                for i in range(n_out)]

    rows = bins(H, out_size)
    cols = bins(W, out_size)
    out = jnp.stack(
        [jnp.stack([x[:, :, r0:r1, c0:c1].mean(axis=(2, 3)) for (c0, c1) in cols], axis=-1)
         for (r0, r1) in rows],
        axis=-2,
    )  # (B, C, out_size, out_size)
    return out


def _ka_attention(x, k, threshold):
    """IKM attention over the kernel window: (B, Cin, k, k), values in (1, 2)."""
    B, Cin, _, _ = x.shape
    mask = jnp.where(x < threshold, jnp.zeros_like(x), jnp.ones_like(x))
    pooled = _adaptive_avg_pool2d(mask, k)                 # (B, Cin, k, k)
    a = pooled.reshape(B, Cin, k * k)
    a = k * k * jax.nn.softmax(a, axis=2) - 1.0
    a = 1.0 + jax.nn.sigmoid(a)
    return a.reshape(B, Cin, k, k)


def dense_conv_forward(x, weight, bias=None, *, stride=1, padding=1, dilation=1,
                       KA=False, threshold=0.0):
    """dense_conv forward: concat(x, ReLU(IKM_conv(x) + bias)) along channels.

    x: (B, Cin, H, W) f32, weight: (Cout, Cin, k, k) f32, bias: (Cout,) f32 or None.
    """
    B, Cin, H, W = x.shape
    Cout, Cin_w, kh, kw = weight.shape
    assert kh == kw and Cin_w == Cin
    k = kh
    assert stride == 1, "dense_conv uses stride=1"
    assert (k - 1) * dilation == 2 * padding, "spatial-size-preserving conv required"

    HW = H * W
    pad_flat = padding * W + padding                       # flat halo on each side
    L = HW + 2 * pad_flat

    # Flat halo-padded activations: reshape is free for contiguous NCHW; the pad is
    # the only extra HBM pass over x.  Kept f32 so the concat passthrough is exact.
    xflat = jnp.pad(x.reshape(B, Cin, HW), ((0, 0), (0, 0), (pad_flat, pad_flat)))

    # Per-tap weight (k*k, Cout, Cin), tap order (dy, dx).  Tiny.
    w_taps = jnp.transpose(weight, (2, 3, 0, 1)).reshape(k * k, Cout, Cin)
    w_taps = w_taps.astype(jnp.float32)

    if bias is None:
        b2 = jnp.zeros((Cout, 1), jnp.float32)
    else:
        b2 = bias.astype(jnp.float32).reshape(Cout, 1)

    if KA:
        att = _ka_attention(x, k, threshold)               # (B, Cin, k, k)
        att_taps = jnp.transpose(att, (0, 2, 3, 1)).reshape(B, k * k, 1, Cin)
        att_taps = att_taps.astype(jnp.float32)
    else:
        att_taps = jnp.ones((B, k * k, 1, Cin), jnp.float32)

    # Per-dx masks: zero where the flat shift wrapped across a W row boundary.
    wpos = jnp.arange(HW, dtype=jnp.int32) % W
    cpos = wpos[None, :] + (jnp.arange(k, dtype=jnp.int32) * dilation - padding)[:, None]
    masks = ((cpos >= 0) & (cpos < W)).astype(jnp.float32).reshape(k, 1, HW)

    kern = functools.partial(_dense_conv_kernel, cin=Cin, cout=Cout, k=k,
                             dil=dilation, W=W, HW=HW, pad_flat=pad_flat)

    out = pl.pallas_call(
        kern,
        out_shape=jax.ShapeDtypeStruct((B, Cin + Cout, HW), jnp.float32),
        grid_spec=pltpu.PrefetchScalarGridSpec(
            num_scalar_prefetch=0,
            grid=(B,),
            in_specs=[
                pl.BlockSpec((1, Cin, L), lambda b: (b, 0, 0)),
                pl.BlockSpec((k * k, Cout, Cin), lambda b: (0, 0, 0)),
                pl.BlockSpec((Cout, 1), lambda b: (0, 0)),
                pl.BlockSpec((1, k * k, 1, Cin), lambda b: (b, 0, 0, 0)),
                pl.BlockSpec((k, 1, HW), lambda b: (0, 0, 0)),
            ],
            out_specs=pl.BlockSpec((1, Cin + Cout, HW), lambda b: (b, 0, 0)),
        ),
        compiler_params=pltpu.CompilerParams(
            dimension_semantics=("parallel",),
            vmem_limit_bytes=32 * 1024 * 1024,
        ),
    )(xflat, w_taps, b2, att_taps, masks)

    # Free reshape back to NCHW; no transpose / slice / concatenate passes needed.
    return out.reshape(B, Cin + Cout, H, W)


# ------------------------------ reference -------------------------------------
def _dense_conv_reference(x, weight, bias, *, stride, padding, dilation, KA, threshold=0.0):
    B, Cin, H, W = x.shape
    Cout, _, k, _ = weight.shape
    dn = ("NCHW", "OIHW", "NCHW")
    if KA:
        att = _ka_attention(x, k, threshold).reshape(B, 1, Cin, k, k)
        w_b = weight[None] * att                           # (B, Cout, Cin, k, k)
        outs = []
        for b in range(B):
            outs.append(lax.conv_general_dilated(
                x[b:b + 1], w_b[b], (stride, stride),
                ((padding, padding), (padding, padding)),
                rhs_dilation=(dilation, dilation), dimension_numbers=dn)[0])
        y = jnp.stack(outs)
    else:
        y = lax.conv_general_dilated(
            x, weight, (stride, stride),
            ((padding, padding), (padding, padding)),
            rhs_dilation=(dilation, dilation), dimension_numbers=dn)
    if bias is not None:
        y = y + bias[None, :, None, None]
    y = jnp.maximum(y, 0.0)
    return jnp.concatenate([x, y], axis=1)


# --------------------------------- main ----------------------------------------
if __name__ == "__main__":
    B, in_feats, grow_rate, H, W, k = 2, 4, 8, 16, 16, 3

    key = jax.random.PRNGKey(0)
    kx, kw_, kb = jax.random.split(key, 3)
    x = jax.random.normal(kx, (B, in_feats, H, W), dtype=jnp.float32)
    fan_in = in_feats * k * k
    weight = jax.random.normal(kw_, (grow_rate, in_feats, k, k),
                               dtype=jnp.float32) / math.sqrt(fan_in)
    bias = 0.1 * jax.random.normal(kb, (grow_rate,), dtype=jnp.float32)

    # Tolerance loosened vs. pure-f32 because the matmul feeds the MXU bf16 inputs
    # (f32 accumulation).
    ATOL = RTOL = 5e-2

    # 1) dense_conv defaults: KA=False, bias=True.
    y = dense_conv_forward(x, weight, bias, padding=1, KA=False)
    y = jax.block_until_ready(y)
    y_ref = _dense_conv_reference(x, weight, bias, stride=1, padding=1, dilation=1, KA=False)
    assert y.shape == (B, in_feats + grow_rate, H, W)
    assert jnp.allclose(y[:, :in_feats], x), "x passthrough (fused concat) mismatch"
    assert jnp.allclose(y, y_ref, atol=ATOL, rtol=RTOL), "dense_conv (KA=False) mismatch"

    # 2) KA path (attention-modulated weight; bias off, as in the usable PyTorch KA config).
    y2 = dense_conv_forward(x, weight, None, padding=1, KA=True)
    y2 = jax.block_until_ready(y2)
    y2_ref = _dense_conv_reference(x, weight, None, stride=1, padding=1, dilation=1, KA=True)
    assert y2.shape == (B, in_feats + grow_rate, H, W)
    assert jnp.allclose(y2, y2_ref, atol=ATOL, rtol=RTOL), "dense_conv (KA=True) mismatch"

    print("KERNEL_OK")
</pallas_src>

<mosaic_0001>
module attributes {stable_mosaic.version = 11 : i64} {
  func.func @_dense_conv_kernel(%arg0: i32, %arg1: memref<1x4x290xf32, #tpu.memory_space<vmem>>, %arg2: memref<9x8x4xf32, #tpu.memory_space<vmem>>, %arg3: memref<8x1xf32, #tpu.memory_space<vmem>>, %arg4: memref<1x9x1x4xf32, #tpu.memory_space<vmem>>, %arg5: memref<3x1x256xf32, #tpu.memory_space<vmem>>, %arg6: memref<1x12x256xf32, #tpu.memory_space<vmem>>) attributes {dimension_semantics = [#tpu.dimension_semantics<parallel>], iteration_bounds = array<i64: 2>, scalar_prefetch = 0 : i64, scratch_operands = 0 : i64, tpu.core_type = #tpu.core_type<tc>, window_params = [{transform_indices = @transform_0, window_bounds = array<i64: 1, 4, 290>}, {pipeline_mode = #tpu.pipeline_mode<synchronous>, transform_indices = @transform_1, window_bounds = array<i64: 9, 8, 4>}, {pipeline_mode = #tpu.pipeline_mode<synchronous>, transform_indices = @transform_2, window_bounds = array<i64: 8, 1>}, {transform_indices = @transform_3, window_bounds = array<i64: 1, 9, 1, 4>}, {pipeline_mode = #tpu.pipeline_mode<synchronous>, transform_indices = @transform_4, window_bounds = array<i64: 3, 1, 256>}, {transform_indices = @transform_5, window_bounds = array<i64: 1, 12, 256>}]} {
    %c0 = arith.constant 0 : index
    %c0_0 = arith.constant 0 : index
    %c0_1 = arith.constant 0 : index
    %0 = vector.load %arg1[%c0, %c0_0, %c0_1] : memref<1x4x290xf32, #tpu.memory_space<vmem>>, vector<1x4x290xf32>
    %1 = vector.shape_cast %0 : vector<1x4x290xf32> to vector<4x290xf32>
    %2 = vector.extract_strided_slice %1 {offsets = [0, 17], sizes = [4, 256], strides = [1, 1]} : vector<4x290xf32> to vector<4x256xf32>
    %c0_2 = arith.constant 0 : index
    %c0_3 = arith.constant 0 : index
    %c0_4 = arith.constant 0 : index
    %3 = vector.load %arg6[%c0_2, %c0_3, %c0_4] : memref<1x12x256xf32, #tpu.memory_space<vmem>>, vector<1x4x256xf32>
    %4 = vector.shape_cast %3 : vector<1x4x256xf32> to vector<4x256xf32>
    %5 = vector.shape_cast %2 : vector<4x256xf32> to vector<1x4x256xf32>
    tpu.vector_store %arg6[%c0_2, %c0_3, %c0_4], %5 {strides = array<i32>} : memref<1x12x256xf32, #tpu.memory_space<vmem>>, vector<1x4x256xf32>,
    %cst = arith.constant 0.000000e+00 : f32
    %6 = vector.broadcast %cst : f32 to vector<8x256xf32>
    %7 = vector.extract_strided_slice %1 {offsets = [0, 0], sizes = [4, 256], strides = [1, 1]} : vector<4x290xf32> to vector<4x256xf32>
    %c0_5 = arith.constant 0 : index
    %c0_6 = arith.constant 0 : index
    %c0_7 = arith.constant 0 : index
    %8 = vector.load %arg5[%c0_5, %c0_6, %c0_7] : memref<3x1x256xf32, #tpu.memory_space<vmem>>, vector<1x1x256xf32>
    %9 = vector.shape_cast %8 : vector<1x1x256xf32> to vector<1x256xf32>
    %10 = vector.broadcast %9 : vector<1x256xf32> to vector<4x256xf32>
    %11 = arith.mulf %7, %10 : vector<4x256xf32>
    %12 = arith.truncf %11 : vector<4x256xf32> to vector<4x256xbf16>
    %c0_8 = arith.constant 0 : index
    %c0_9 = arith.constant 0 : index
    %c0_10 = arith.constant 0 : index
    %13 = vector.load %arg2[%c0_8, %c0_9, %c0_10] : memref<9x8x4xf32, #tpu.memory_space<vmem>>, vector<1x8x4xf32>
    %14 = vector.shape_cast %13 : vector<1x8x4xf32> to vector<8x4xf32>
    %c0_11 = arith.constant 0 : index
    %c0_12 = arith.constant 0 : index
    %c0_13 = arith.constant 0 : index
    %c0_14 = arith.constant 0 : index
    %15 = vector.load %arg4[%c0_11, %c0_12, %c0_13, %c0_14] : memref<1x9x1x4xf32, #tpu.memory_space<vmem>>, vector<1x1x1x4xf32>
    %16 = vector.shape_cast %15 : vector<1x1x1x4xf32> to vector<1x4xf32>
    %17 = vector.broadcast %16 : vector<1x4xf32> to vector<8x4xf32>
    %18 = arith.mulf %14, %17 : vector<8x4xf32>
    %19 = arith.truncf %18 : vector<8x4xf32> to vector<8x4xbf16>
    %cst_15 = arith.constant dense<0.000000e+00> : vector<8x256xf32>
    %20 = tpu.matmul %19, %12, %cst_15 {dimension_numbers = #tpu.dot_dimension_numbers<[1], [0], [0], [1], [0, 0, 1, 1], [], []>} : vector<8x4xbf16>, vector<4x256xbf16>, vector<8x256xf32> -> vector<8x256xf32>
    %21 = arith.addf %6, %20 : vector<8x256xf32>
    %22 = vector.extract_strided_slice %1 {offsets = [0, 1], sizes = [4, 256], strides = [1, 1]} : vector<4x290xf32> to vector<4x256xf32>
    %c1 = arith.constant 1 : index
    %c0_16 = arith.constant 0 : index
    %c0_17 = arith.constant 0 : index
    %23 = vector.load %arg5[%c1, %c0_16, %c0_17] : memref<3x1x256xf32, #tpu.memory_space<vmem>>, vector<1x1x256xf32>
    %24 = vector.shape_cast %23 : vector<1x1x256xf32> to vector<1x256xf32>
    %25 = vector.broadcast %24 : vector<1x256xf32> to vector<4x256xf32>
    %26 = arith.mulf %22, %25 : vector<4x256xf32>
    %27 = arith.truncf %26 : vector<4x256xf32> to vector<4x256xbf16>
    %c1_18 = arith.constant 1 : index
    %c0_19 = arith.constant 0 : index
    %c0_20 = arith.constant 0 : index
    %28 = vector.load %arg2[%c1_18, %c0_19, %c0_20] : memref<9x8x4xf32, #tpu.memory_space<vmem>>, vector<1x8x4xf32>
    %29 = vector.shape_cast %28 : vector<1x8x4xf32> to vector<8x4xf32>
    %c0_21 = arith.constant 0 : index
    %c1_22 = arith.constant 1 : index
    %c0_23 = arith.constant 0 : index
    %c0_24 = arith.constant 0 : index
    %30 = vector.load %arg4[%c0_21, %c1_22, %c0_23, %c0_24] : memref<1x9x1x4xf32, #tpu.memory_space<vmem>>, vector<1x1x1x4xf32>
    %31 = vector.shape_cast %30 : vector<1x1x1x4xf32> to vector<1x4xf32>
    %32 = vector.broadcast %31 : vector<1x4xf32> to vector<8x4xf32>
    %33 = arith.mulf %29, %32 : vector<8x4xf32>
    %34 = arith.truncf %33 : vector<8x4xf32> to vector<8x4xbf16>
    %cst_25 = arith.constant dense<0.000000e+00> : vector<8x256xf32>
    %35 = tpu.matmul %34, %27, %cst_25 {dimension_numbers = #tpu.dot_dimension_numbers<[1], [0], [0], [1], [0, 0, 1, 1], [], []>} : vector<8x4xbf16>, vector<4x256xbf16>, vector<8x256xf32> -> vector<8x256xf32>
    %36 = arith.addf %21, %35 : vector<8x256xf32>
    %37 = vector.extract_strided_slice %1 {offsets = [0, 2], sizes = [4, 256], strides = [1, 1]} : vector<4x290xf32> to vector<4x256xf32>
    %c2 = arith.constant 2 : index
    %c0_26 = arith.constant 0 : index
    %c0_27 = arith.constant 0 : index
    %38 = vector.load %arg5[%c2, %c0_26, %c0_27] : memref<3x1x256xf32, #tpu.memory_space<vmem>>, vector<1x1x256xf32>
    %39 = vector.shape_cast %38 : vector<1x1x256xf32> to vector<1x256xf32>
    %40 = vector.broadcast %39 : vector<1x256xf32> to vector<4x256xf32>
    %41 = arith.mulf %37, %40 : vector<4x256xf32>
    %42 = arith.truncf %41 : vector<4x256xf32> to vector<4x256xbf16>
    %c2_28 = arith.constant 2 : index
    %c0_29 = arith.constant 0 : index
    %c0_30 = arith.constant 0 : index
    %43 = vector.load %arg2[%c2_28, %c0_29, %c0_30] : memref<9x8x4xf32, #tpu.memory_space<vmem>>, vector<1x8x4xf32>
    %44 = vector.shape_cast %43 : vector<1x8x4xf32> to vector<8x4xf32>
    %c0_31 = arith.constant 0 : index
    %c2_32 = arith.constant 2 : index
    %c0_33 = arith.constant 0 : index
    %c0_34 = arith.constant 0 : index
    %45 = vector.load %arg4[%c0_31, %c2_32, %c0_33, %c0_34] : memref<1x9x1x4xf32, #tpu.memory_space<vmem>>, vector<1x1x1x4xf32>
    %46 = vector.shape_cast %45 : vector<1x1x1x4xf32> to vector<1x4xf32>
    %47 = vector.broadcast %46 : vector<1x4xf32> to vector<8x4xf32>
    %48 = arith.mulf %44, %47 : vector<8x4xf32>
    %49 = arith.truncf %48 : vector<8x4xf32> to vector<8x4xbf16>
    %cst_35 = arith.constant dense<0.000000e+00> : vector<8x256xf32>
    %50 = tpu.matmul %49, %42, %cst_35 {dimension_numbers = #tpu.dot_dimension_numbers<[1], [0], [0], [1], [0, 0, 1, 1], [], []>} : vector<8x4xbf16>, vector<4x256xbf16>, vector<8x256xf32> -> vector<8x256xf32>
    %51 = arith.addf %36, %50 : vector<8x256xf32>
    %52 = vector.extract_strided_slice %1 {offsets = [0, 16], sizes = [4, 256], strides = [1, 1]} : vector<4x290xf32> to vector<4x256xf32>
    %c0_36 = arith.constant 0 : index
    %c0_37 = arith.constant 0 : index
    %c0_38 = arith.constant 0 : index
    %53 = vector.load %arg5[%c0_36, %c0_37, %c0_38] : memref<3x1x256xf32, #tpu.memory_space<vmem>>, vector<1x1x256xf32>
    %54 = vector.shape_cast %53 : vector<1x1x256xf32> to vector<1x256xf32>
    %55 = vector.broadcast %54 : vector<1x256xf32> to vector<4x256xf32>
    %56 = arith.mulf %52, %55 : vector<4x256xf32>
    %57 = arith.truncf %56 : vector<4x256xf32> to vector<4x256xbf16>
    %c3 = arith.constant 3 : index
    %c0_39 = arith.constant 0 : index
    %c0_40 = arith.constant 0 : index
    %58 = vector.load %arg2[%c3, %c0_39, %c0_40] : memref<9x8x4xf32, #tpu.memory_space<vmem>>, vector<1x8x4xf32>
    %59 = vector.shape_cast %58 : vector<1x8x4xf32> to vector<8x4xf32>
    %c0_41 = arith.constant 0 : index
    %c3_42 = arith.constant 3 : index
    %c0_43 = arith.constant 0 : index
    %c0_44 = arith.constant 0 : index
    %60 = vector.load %arg4[%c0_41, %c3_42, %c0_43, %c0_44] : memref<1x9x1x4xf32, #tpu.memory_space<vmem>>, vector<1x1x1x4xf32>
    %61 = vector.shape_cast %60 : vector<1x1x1x4xf32> to vector<1x4xf32>
    %62 = vector.broadcast %61 : vector<1x4xf32> to vector<8x4xf32>
    %63 = arith.mulf %59, %62 : vector<8x4xf32>
    %64 = arith.truncf %63 : vector<8x4xf32> to vector<8x4xbf16>
    %cst_45 = arith.constant dense<0.000000e+00> : vector<8x256xf32>
    %65 = tpu.matmul %64, %57, %cst_45 {dimension_numbers = #tpu.dot_dimension_numbers<[1], [0], [0], [1], [0, 0, 1, 1], [], []>} : vector<8x4xbf16>, vector<4x256xbf16>, vector<8x256xf32> -> vector<8x256xf32>
    %66 = arith.addf %51, %65 : vector<8x256xf32>
    %67 = vector.extract_strided_slice %1 {offsets = [0, 17], sizes = [4, 256], strides = [1, 1]} : vector<4x290xf32> to vector<4x256xf32>
    %c1_46 = arith.constant 1 : index
    %c0_47 = arith.constant 0 : index
    %c0_48 = arith.constant 0 : index
    %68 = vector.load %arg5[%c1_46, %c0_47, %c0_48] : memref<3x1x256xf32, #tpu.memory_space<vmem>>, vector<1x1x256xf32>
    %69 = vector.shape_cast %68 : vector<1x1x256xf32> to vector<1x256xf32>
    %70 = vector.broadcast %69 : vector<1x256xf32> to vector<4x256xf32>
    %71 = arith.mulf %67, %70 : vector<4x256xf32>
    %72 = arith.truncf %71 : vector<4x256xf32> to vector<4x256xbf16>
    %c4 = arith.constant 4 : index
    %c0_49 = arith.constant 0 : index
    %c0_50 = arith.constant 0 : index
    %73 = vector.load %arg2[%c4, %c0_49, %c0_50] : memref<9x8x4xf32, #tpu.memory_space<vmem>>, vector<1x8x4xf32>
    %74 = vector.shape_cast %73 : vector<1x8x4xf32> to vector<8x4xf32>
    %c0_51 = arith.constant 0 : index
    %c4_52 = arith.constant 4 : index
    %c0_53 = arith.constant 0 : index
    %c0_54 = arith.constant 0 : index
    %75 = vector.load %arg4[%c0_51, %c4_52, %c0_53, %c0_54] : memref<1x9x1x4xf32, #tpu.memory_space<vmem>>, vector<1x1x1x4xf32>
    %76 = vector.shape_cast %75 : vector<1x1x1x4xf32> to vector<1x4xf32>
    %77 = vector.broadcast %76 : vector<1x4xf32> to vector<8x4xf32>
    %78 = arith.mulf %74, %77 : vector<8x4xf32>
    %79 = arith.truncf %78 : vector<8x4xf32> to vector<8x4xbf16>
    %cst_55 = arith.constant dense<0.000000e+00> : vector<8x256xf32>
    %80 = tpu.matmul %79, %72, %cst_55 {dimension_numbers = #tpu.dot_dimension_numbers<[1], [0], [0], [1], [0, 0, 1, 1], [], []>} : vector<8x4xbf16>, vector<4x256xbf16>, vector<8x256xf32> -> vector<8x256xf32>
    %81 = arith.addf %66, %80 : vector<8x256xf32>
    %82 = vector.extract_strided_slice %1 {offsets = [0, 18], sizes = [4, 256], strides = [1, 1]} : vector<4x290xf32> to vector<4x256xf32>
    %c2_56 = arith.constant 2 : index
    %c0_57 = arith.constant 0 : index
    %c0_58 = arith.constant 0 : index
    %83 = vector.load %arg5[%c2_56, %c0_57, %c0_58] : memref<3x1x256xf32, #tpu.memory_space<vmem>>, vector<1x1x256xf32>
    %84 = vector.shape_cast %83 : vector<1x1x256xf32> to vector<1x256xf32>
    %85 = vector.broadcast %84 : vector<1x256xf32> to vector<4x256xf32>
    %86 = arith.mulf %82, %85 : vector<4x256xf32>
    %87 = arith.truncf %86 : vector<4x256xf32> to vector<4x256xbf16>
    %c5 = arith.constant 5 : index
    %c0_59 = arith.constant 0 : index
    %c0_60 = arith.constant 0 : index
    %88 = vector.load %arg2[%c5, %c0_59, %c0_60] : memref<9x8x4xf32, #tpu.memory_space<vmem>>, vector<1x8x4xf32>
    %89 = vector.shape_cast %88 : vector<1x8x4xf32> to vector<8x4xf32>
    %c0_61 = arith.constant 0 : index
    %c5_62 = arith.constant 5 : index
    %c0_63 = arith.constant 0 : index
    %c0_64 = arith.constant 0 : index
    %90 = vector.load %arg4[%c0_61, %c5_62, %c0_63, %c0_64] : memref<1x9x1x4xf32, #tpu.memory_space<vmem>>, vector<1x1x1x4xf32>
    %91 = vector.shape_cast %90 : vector<1x1x1x4xf32> to vector<1x4xf32>
    %92 = vector.broadcast %91 : vector<1x4xf32> to vector<8x4xf32>
    %93 = arith.mulf %89, %92 : vector<8x4xf32>
    %94 = arith.truncf %93 : vector<8x4xf32> to vector<8x4xbf16>
    %cst_65 = arith.constant dense<0.000000e+00> : vector<8x256xf32>
    %95 = tpu.matmul %94, %87, %cst_65 {dimension_numbers = #tpu.dot_dimension_numbers<[1], [0], [0], [1], [0, 0, 1, 1], [], []>} : vector<8x4xbf16>, vector<4x256xbf16>, vector<8x256xf32> -> vector<8x256xf32>
    %96 = arith.addf %81, %95 : vector<8x256xf32>
    %97 = vector.extract_strided_slice %1 {offsets = [0, 32], sizes = [4, 256], strides = [1, 1]} : vector<4x290xf32> to vector<4x256xf32>
    %c0_66 = arith.constant 0 : index
    %c0_67 = arith.constant 0 : index
    %c0_68 = arith.constant 0 : index
    %98 = vector.load %arg5[%c0_66, %c0_67, %c0_68] : memref<3x1x256xf32, #tpu.memory_space<vmem>>, vector<1x1x256xf32>
    %99 = vector.shape_cast %98 : vector<1x1x256xf32> to vector<1x256xf32>
    %100 = vector.broadcast %99 : vector<1x256xf32> to vector<4x256xf32>
    %101 = arith.mulf %97, %100 : vector<4x256xf32>
    %102 = arith.truncf %101 : vector<4x256xf32> to vector<4x256xbf16>
    %c6 = arith.constant 6 : index
    %c0_69 = arith.constant 0 : index
    %c0_70 = arith.constant 0 : index
    %103 = vector.load %arg2[%c6, %c0_69, %c0_70] : memref<9x8x4xf32, #tpu.memory_space<vmem>>, vector<1x8x4xf32>
    %104 = vector.shape_cast %103 : vector<1x8x4xf32> to vector<8x4xf32>
    %c0_71 = arith.constant 0 : index
    %c6_72 = arith.constant 6 : index
    %c0_73 = arith.constant 0 : index
    %c0_74 = arith.constant 0 : index
    %105 = vector.load %arg4[%c0_71, %c6_72, %c0_73, %c0_74] : memref<1x9x1x4xf32, #tpu.memory_space<vmem>>, vector<1x1x1x4xf32>
    %106 = vector.shape_cast %105 : vector<1x1x1x4xf32> to vector<1x4xf32>
    %107 = vector.broadcast %106 : vector<1x4xf32> to vector<8x4xf32>
    %108 = arith.mulf %104, %107 : vector<8x4xf32>
    %109 = arith.truncf %108 : vector<8x4xf32> to vector<8x4xbf16>
    %cst_75 = arith.constant dense<0.000000e+00> : vector<8x256xf32>
    %110 = tpu.matmul %109, %102, %cst_75 {dimension_numbers = #tpu.dot_dimension_numbers<[1], [0], [0], [1], [0, 0, 1, 1], [], []>} : vector<8x4xbf16>, vector<4x256xbf16>, vector<8x256xf32> -> vector<8x256xf32>
    %111 = arith.addf %96, %110 : vector<8x256xf32>
    %112 = vector.extract_strided_slice %1 {offsets = [0, 33], sizes = [4, 256], strides = [1, 1]} : vector<4x290xf32> to vector<4x256xf32>
    %c1_76 = arith.constant 1 : index
    %c0_77 = arith.constant 0 : index
    %c0_78 = arith.constant 0 : index
    %113 = vector.load %arg5[%c1_76, %c0_77, %c0_78] : memref<3x1x256xf32, #tpu.memory_space<vmem>>, vector<1x1x256xf32>
    %114 = vector.shape_cast %113 : vector<1x1x256xf32> to vector<1x256xf32>
    %115 = vector.broadcast %114 : vector<1x256xf32> to vector<4x256xf32>
    %116 = arith.mulf %112, %115 : vector<4x256xf32>
    %117 = arith.truncf %116 : vector<4x256xf32> to vector<4x256xbf16>
    %c7 = arith.constant 7 : index
    %c0_79 = arith.constant 0 : index
    %c0_80 = arith.constant 0 : index
    %118 = vector.load %arg2[%c7, %c0_79, %c0_80] : memref<9x8x4xf32, #tpu.memory_space<vmem>>, vector<1x8x4xf32>
    %119 = vector.shape_cast %118 : vector<1x8x4xf32> to vector<8x4xf32>
    %c0_81 = arith.constant 0 : index
    %c7_82 = arith.constant 7 : index
    %c0_83 = arith.constant 0 : index
    %c0_84 = arith.constant 0 : index
    %120 = vector.load %arg4[%c0_81, %c7_82, %c0_83, %c0_84] : memref<1x9x1x4xf32, #tpu.memory_space<vmem>>, vector<1x1x1x4xf32>
    %121 = vector.shape_cast %120 : vector<1x1x1x4xf32> to vector<1x4xf32>
    %122 = vector.broadcast %121 : vector<1x4xf32> to vector<8x4xf32>
    %123 = arith.mulf %119, %122 : vector<8x4xf32>
    %124 = arith.truncf %123 : vector<8x4xf32> to vector<8x4xbf16>
    %cst_85 = arith.constant dense<0.000000e+00> : vector<8x256xf32>
    %125 = tpu.matmul %124, %117, %cst_85 {dimension_numbers = #tpu.dot_dimension_numbers<[1], [0], [0], [1], [0, 0, 1, 1], [], []>} : vector<8x4xbf16>, vector<4x256xbf16>, vector<8x256xf32> -> vector<8x256xf32>
    %126 = arith.addf %111, %125 : vector<8x256xf32>
    %127 = vector.extract_strided_slice %1 {offsets = [0, 34], sizes = [4, 256], strides = [1, 1]} : vector<4x290xf32> to vector<4x256xf32>
    %c2_86 = arith.constant 2 : index
    %c0_87 = arith.constant 0 : index
    %c0_88 = arith.constant 0 : index
    %128 = vector.load %arg5[%c2_86, %c0_87, %c0_88] : memref<3x1x256xf32, #tpu.memory_space<vmem>>, vector<1x1x256xf32>
    %129 = vector.shape_cast %128 : vector<1x1x256xf32> to vector<1x256xf32>
    %130 = vector.broadcast %129 : vector<1x256xf32> to vector<4x256xf32>
    %131 = arith.mulf %127, %130 : vector<4x256xf32>
    %132 = arith.truncf %131 : vector<4x256xf32> to vector<4x256xbf16>
    %c8 = arith.constant 8 : index
    %c0_89 = arith.constant 0 : index
    %c0_90 = arith.constant 0 : index
    %133 = vector.load %arg2[%c8, %c0_89, %c0_90] : memref<9x8x4xf32, #tpu.memory_space<vmem>>, vector<1x8x4xf32>
    %134 = vector.shape_cast %133 : vector<1x8x4xf32> to vector<8x4xf32>
    %c0_91 = arith.constant 0 : index
    %c8_92 = arith.constant 8 : index
    %c0_93 = arith.constant 0 : index
    %c0_94 = arith.constant 0 : index
    %135 = vector.load %arg4[%c0_91, %c8_92, %c0_93, %c0_94] : memref<1x9x1x4xf32, #tpu.memory_space<vmem>>, vector<1x1x1x4xf32>
    %136 = vector.shape_cast %135 : vector<1x1x1x4xf32> to vector<1x4xf32>
    %137 = vector.broadcast %136 : vector<1x4xf32> to vector<8x4xf32>
    %138 = arith.mulf %134, %137 : vector<8x4xf32>
    %139 = arith.truncf %138 : vector<8x4xf32> to vector<8x4xbf16>
    %cst_95 = arith.constant dense<0.000000e+00> : vector<8x256xf32>
    %140 = tpu.matmul %139, %132, %cst_95 {dimension_numbers = #tpu.dot_dimension_numbers<[1], [0], [0], [1], [0, 0, 1, 1], [], []>} : vector<8x4xbf16>, vector<4x256xbf16>, vector<8x256xf32> -> vector<8x256xf32>
    %141 = arith.addf %126, %140 : vector<8x256xf32>
    %c0_96 = arith.constant 0 : index
    %c0_97 = arith.constant 0 : index
    %142 = vector.load %arg3[%c0_96, %c0_97] : memref<8x1xf32, #tpu.memory_space<vmem>>, vector<8x1xf32>
    %143 = vector.broadcast %142 : vector<8x1xf32> to vector<8x256xf32>
    %144 = arith.addf %141, %143 : vector<8x256xf32>
    %cst_98 = arith.constant 0.000000e+00 : f32
    %145 = vector.broadcast %cst_98 : f32 to vector<8x256xf32>
    %146 = arith.maximumf %144, %145 : vector<8x256xf32>
    %c0_99 = arith.constant 0 : index
    %c4_100 = arith.constant 4 : index
    %c0_101 = arith.constant 0 : index
    %147 = vector.load %arg6[%c0_99, %c4_100, %c0_101] : memref<1x12x256xf32, #tpu.memory_space<vmem>>, vector<1x8x256xf32>
    %148 = vector.shape_cast %147 : vector<1x8x256xf32> to vector<8x256xf32>
    %149 = vector.shape_cast %146 : vector<8x256xf32> to vector<1x8x256xf32>
    tpu.vector_store %arg6[%c0_99, %c4_100, %c0_101], %149 {strides = array<i32>} : memref<1x12x256xf32, #tpu.memory_space<vmem>>, vector<1x8x256xf32>,
    return
  }
  func.func @transform_0(%arg0: i32) -> (i32, i32, i32) {
    %c0_i32 = arith.constant 0 : i32
    %c0_i32_0 = arith.constant 0 : i32
    %c0_i32_1 = arith.constant 0 : i32
    return %arg0, %c0_i32, %c0_i32_0 : i32, i32, i32
  }
  func.func @transform_1(%arg0: i32) -> (i32, i32, i32) {
    %c0_i32 = arith.constant 0 : i32
    %c0_i32_0 = arith.constant 0 : i32
    %c0_i32_1 = arith.constant 0 : i32
    %c0_i32_2 = arith.constant 0 : i32
    return %c0_i32, %c0_i32_0, %c0_i32_1 : i32, i32, i32
  }
  func.func @transform_2(%arg0: i32) -> (i32, i32) {
    %c0_i32 = arith.constant 0 : i32
    %c0_i32_0 = arith.constant 0 : i32
    %c0_i32_1 = arith.constant 0 : i32
    return %c0_i32, %c0_i32_0 : i32, i32
  }
  func.func @transform_3(%arg0: i32) -> (i32, i32, i32, i32) {
    %c0_i32 = arith.constant 0 : i32
    %c0_i32_0 = arith.constant 0 : i32
    %c0_i32_1 = arith.constant 0 : i32
    %c0_i32_2 = arith.constant 0 : i32
    return %arg0, %c0_i32, %c0_i32_0, %c0_i32_1 : i32, i32, i32, i32
  }
  func.func @transform_4(%arg0: i32) -> (i32, i32, i32) {
    %c0_i32 = arith.constant 0 : i32
    %c0_i32_0 = arith.constant 0 : i32
    %c0_i32_1 = arith.constant 0 : i32
    %c0_i32_2 = arith.constant 0 : i32
    return %c0_i32, %c0_i32_0, %c0_i32_1 : i32, i32, i32
  }
  func.func @transform_5(%arg0: i32) -> (i32, i32, i32) {
    %c0_i32 = arith.constant 0 : i32
    %c0_i32_0 = arith.constant 0 : i32
    %c0_i32_1 = arith.constant 0 : i32
    return %arg0, %c0_i32, %c0_i32_0 : i32, i32, i32
  }
}

</mosaic_0001>

<bundles_post_ra>
// kernel: tpu_custom_call.1
= control target key start
LH: loop header
LB: loop body
LE: loop exit
PB: predicated region body
PF: predicated region fallthrough
CT: control target
= control target key end

     0   :  { %s1214_s18 = smov 0   ;;  %s1398_s0 = inlined_call_operand.vmem [shape: f32[2,4,290], index: 0, kind: input, shape index: {}]   ;;  %s1399_s1 = inlined_call_operand.vmem [shape: f32[9,8,4], index: 1, kind: input, shape index: {}]   ;;  %s1400_s2 = inlined_call_operand.vmem [shape: f32[8,1], index: 2, kind: input, shape index: {}]   ;;  %s1401_s3 = inlined_call_operand.vmem [shape: f32[2,9,1,4], index: 3, kind: input, shape index: {}]   ;;  %s1402_s4 = inlined_call_operand.vmem [shape: f32[3,1,256], index: 4, kind: input, shape index: {}]   ;;  %s1403_s5 = inlined_call_operand.vmem [shape: f32[2,12,256], index: 5, kind: output, shape index: {}]  }
   0x1 LB: > { %s1074_s19 = sadd.s32 4294967295, %s1165_s18   ;;  %p1078_p0 = scmp.ge.s32.totalorder %s1165_s18, 1  ;;  %s1165_s18 = sphi %s1214_s18, %s15_s18  }
   0x2   : > { %p196_p1 = scmp.lt.s32.totalorder %s1165_s18, 3 }
   0x4   : > { %p197_p2 = pnand %p1078_p0, %p196_p1 }
   0x5   : > { %p228_p3 = scmp.lt.s32.totalorder (!%p197_p2), %s1074_s19, 1  ;;  %s1167_s26 = smov (!%p197_p2), 1  }
   0x6   : > { %200 = sbr.rel (%p197_p2) target bundleno = 552 (0x228), region = 40  ;;  %s1168_s28 = smov (!%p197_p2), 18  }
   0x7   : > { %s1169_s29 = smov (!%p197_p2), 16   ;;  %s1170_s8 = smov (!%p197_p2), 2  }
   0x8   : > { %s1171_s9 = smov (!%p197_p2), 32   ;;  %s1172_s10 = smov (!%p197_p2), 17  }
   0x9   : > { %s1173_s11 = smov (!%p197_p2), 127   ;;  %s1174_s12 = smov (!%p197_p2), 33  }
   0xa   : > { %s1175_s13 = smov (!%p197_p2), 34   ;;  %s1176_s14 = smov (!%p197_p2), 126  }
   0xb   : > { %v1082_v0 = vld [vmem:[%s1402_s4 + $0x2] sm:$0x3]  ;;  %v1089_v1 = vld [vmem:[%s1402_s4 + $0x4] sm:$0x3]  ;;  %vm271_vm0 = vcmask 1043456   ;;  %s1405_s19 = smov (!%p228_p3, %s1074_s19), 1 }
   0xc   : > { %v293_v2 = vperm.slane %v1082_v0, 0  ;;  %v294_v3 = vperm.slane %v1082_v0, 1  ;;  %v416_v4 = vperm.slane %v1089_v1, 0  ;;  %v417_v5 = vperm.slane %v1089_v1, 1  ;;  %v266_v6 = vld [vmem:[%s1402_s4] sm:$0x3] }
   0xd   : > { %v268_v9 = vperm.slane %v266_v6, 0  ;;  %v269_v10 = vperm.slane %v266_v6, 1  ;;  %s1121_s27 = smul.u32 12, %s1405_s19  ;;  %vm300_vm1 = vcmask 7168   ;;  %vm423_vm2 = vcmask 15360   ;;  %s1177_s21 = smov 112  }
   0xe   : > { %v295_v7 = vrot.slane %v294_v3, 4  ;;  %v418_v8 = vrot.slane %v417_v5, 4  ;;  %vm504_vm3 = vcmask 130048   ;;  %vm585_vm4 = vcmask 138240   ;;  %s1122_s15 = smul.u32 9, %s1405_s19  ;;  %s1178_s22 = smov 111  }
   0xf   : > { %v270_v13 = vrot.slane %v269_v10, 4  ;;  %s232_s7 = scalar_lea.vmem %s1398_s0, %s1121_s27  ;;  %vm666_vm5 = vcmask 146432   ;;  %vm747_vm6 = vcmask 261120   ;;  %s1179_s23 = smov 110   ;;  %vm338_vm7 = vcmask 1039360  }
  0x10   : > { %v1234_v11 = vsel %vm271_vm0, %v293_v2, %v295_v7  ;;  %v1237_v12 = vsel %vm271_vm0, %v416_v4, %v418_v8  ;;  %v1246_v15 = vld [vmem:[%s232_s7] sm:$0xff]  ;;  %v1256_v19 = vld [vmem:[%s232_s7 + $0x8] sm:$0xf]  ;;  %s1282_s20 = scalar_lea.vmem %s1401_s3, %s1122_s15  ;;  %s1180_s24 = smov 96   ;;  %vm345_vm8 = vcmask 1041408   ;;  %vm341_vm9 = vcmask 31744  }
  0x11   : > { %297 = vrot.lane.b32.xlu0 %v1234_v11, %s1167_s26  ;;  %663 = vrot.lane.b32.xlu2 %v1237_v12, %s1168_s28  ;;  %v272_v14 = vsel %vm271_vm0, %v268_v9, %v270_v13  ;;  %247 = vst [vmem:[#allocation1] ss:$2 sm:$0xff] %v1246_v15  ;;  %vm828_vm10 = vcmask 269312   ;;  %vm461_vm11 = vcmask 1031168   ;;  %vm909_vm12 = vcmask 277504  }
  0x12   : > { %501 = vrot.lane.b32.xlu1 %v272_v14, %s1169_s29  ;;  %v274_v16 = vmul.f32 %v272_v14, %v1246_v15  ;;  %249 = vst [vmem:[#allocation1 + $0x10] ss:$2 sm:$0xff] %v1256_v19  ;;  %vm542_vm13 = vcmask 916480   ;;  %vm259_vm14 = vcmask 908288   ;;  %vm704_vm15 = vcmask 900096  }
  0x13   : > { %vm785_vm0 = vcmask 785408  }
  0x18   : > { %v1252_v17 = vld.sshfl [vmem:[#allocation1] sm:$0xff pattern:$0x75316420]  ;;  %v1254_v18 = vld.sshfl [vmem:[#allocation1 + $0x8] sm:$0xff pattern:$0x75316420] }
  0x19   : > { %420 = vrot.lane.b32.xlu0 %v1237_v12, %s1170_s8  ;;  %744 = vrot.lane.b32.xlu2 %v272_v14, %s1171_s9  ;;  %276 = vst [vmem:[#allocation1] ss:$2 sm:$0xff] %v274_v16  ;;  %v1259_v22 = vld.sshfl [vmem:[#allocation1 + $0x10] sm:$0xff pattern:$0x75316420]  ;;  %s1181_s8 = smov 95  }
  0x1a   : > { %582 = vrot.lane.b32.xlu1 %v1234_v11, %s1172_s10  ;;  %s1182_s9 = smov 94  }
  0x20   : > { %v1261_v23 = vld.sshfl [vmem:[#allocation1] sm:$0xff pattern:$0x75316420]  ;;  %v1263_v24 = vld.sshfl [vmem:[#allocation1 + $0x8] sm:$0xff pattern:$0x75316420] }
  0x6b   : > { %v664_v50 = vpop.permute.xlu2 %663 }
  0x6c   : > { %v665_v53 = vrot.slane %v664_v50, 4 }
  0x6e   : > { %v667_v59 = vsel %vm666_vm5, %v665_v53, %v664_v50  ;;  %v671_v3 = vmul.f32 %v665_v53, %v1256_v19 }
  0x6f   : > { %v670_v60 = vmul.f32 %v667_v59, %v1246_v15 }
  0x73   : > { %v745_v2 = vpop.permute.xlu2 %744 }
  0x74   : > { %v746_v4 = vrot.slane %v745_v2, 4 }
  0x76   : > { %v748_v7 = vsel %vm747_vm6, %v746_v4, %v745_v2  ;;  %v752_v9 = vmul.f32 %v746_v4, %v1256_v19 }
  0x77   : > { %v751_v8 = vmul.f32 %v748_v7, %v1246_v15 }
  0x83   : > { %v298_v20 = vpop.permute.xlu0 %297 }
  0x84   : > { %v299_v21 = vrot.slane %v298_v20, 4  ;;  %v502_v28 = vpop.permute.xlu1 %501 }
  0x85   : > { %v503_v33 = vrot.slane %v502_v28, 4 }
  0x86   : > { %v301_v25 = vsel %vm300_vm1, %v299_v21, %v298_v20  ;;  %v305_v26 = vmul.f32 %v299_v21, %v1256_v19  ;;  %vm866_vm1 = vcmask 777216  }
  0x87   : > { %v304_v27 = vmul.f32 %v301_v25, %v1246_v15  ;;  %v505_v41 = vsel %vm504_vm3, %v503_v33, %v502_v28  ;;  %v509_v44 = vmul.f32 %v503_v33, %v1256_v19 }
  0x88   : > { %310 = vst [vmem:[#allocation1 + $0x10] ss:$2 sm:$0xff] %v305_v26  ;;  %v508_v43 = vmul.f32 %v505_v41, %v1246_v15 }
  0x89   : > { %308 = vst [vmem:[#allocation1] ss:$2 sm:$0xff] %v304_v27 }
  0x8b   : > { %v421_v29 = vpop.permute.xlu0 %420 }
  0x8c   : > { %v422_v30 = vrot.slane %v421_v29, 4  ;;  %v583_v42 = vpop.permute.xlu1 %582 }
  0x8d   : > { %v584_v45 = vrot.slane %v583_v42, 4 }
  0x8e   : > { %v424_v31 = vsel %vm423_vm2, %v422_v30, %v421_v29  ;;  %v428_v32 = vmul.f32 %v422_v30, %v1256_v19  ;;  %vm947_vm2 = vcmask 769024  }
  0x8f   : > { %v313_v34 = vld.sshfl [vmem:[#allocation1 + $0x10] sm:$0xff pattern:$0x75316420]  ;;  %v427_v35 = vmul.f32 %v424_v31, %v1246_v15  ;;  %v586_v49 = vsel %vm585_vm4, %v584_v45, %v583_v42  ;;  %v590_v52 = vmul.f32 %v584_v45, %v1256_v19 }
  0x90   : > { %v319_v36 = vpack.c.bf16 %v313_v34, %v313_v34  ;;  %v312_v37 = vld.sshfl [vmem:[#allocation1 + $0x8] sm:$0xff pattern:$0x75316420]  ;;  %v311_v38 = vld.sshfl [vmem:[#allocation1] sm:$0xff pattern:$0x75316420]  ;;  %v589_v51 = vmul.f32 %v586_v49, %v1246_v15 }
  0x91   : > { %v318_v39 = vpack.c.bf16 %v312_v37, %v312_v37  ;;  %v317_v40 = vpack.c.bf16 %v311_v38, %v311_v38  ;;  %431 = vst [vmem:[#allocation1] ss:$2 sm:$0xff] %v427_v35  ;;  %v1083_v37 = vld [vmem:[%s1399_s1 + $0x8] sm:$0xff]  ;;  %v1150_v38 = vld [vmem:[%s1282_s20 + $0x1] ss:$0 sm:$0xff] }
  0x92   : > { %336 = vrot.lane.b32.xlu2 %v319_v36, %s1173_s11  ;;  %433 = vst [vmem:[#allocation1 + $0x10] ss:$2 sm:$0xff] %v428_v32  ;;  %v327_v45 = vmul.f32 %v1150_v38, %v1083_v37 }
  0x93   : > { %334 = vrot.lane.b32.xlu1 %v318_v39, %s1173_s11  ;;  %332 = vrot.lane.b32.xlu0 %v317_v40, %s1173_s11  ;;  %v281_v39 = vpack.c.bf16 %v1261_v23, %v1261_v23  ;;  %v283_v40 = vld [vmem:[%s1399_s1] sm:$0xff] }
  0x98   : > { %v434_v46 = vld.sshfl [vmem:[#allocation1] sm:$0xff pattern:$0x75316420]  ;;  %v435_v47 = vld.sshfl [vmem:[#allocation1 + $0x8] sm:$0xff pattern:$0x75316420] }
  0x99   : > { %v436_v48 = vld.sshfl [vmem:[#allocation1 + $0x10] sm:$0xff pattern:$0x75316420]  ;;  %512 = vst [vmem:[#allocation1] ss:$2 sm:$0xff] %v508_v43  ;;  %v441_v54 = vpack.c.bf16 %v435_v47, %v435_v47  ;;  %v282_v43 = vpack.c.bf16 %v1263_v24, %v1263_v24 }
  0x9a   : > { %514 = vst [vmem:[#allocation1 + $0x10] ss:$2 sm:$0xff] %v509_v44  ;;  %v442_v55 = vpack.c.bf16 %v436_v48, %v436_v48  ;;  %v1151_v44 = vld [vmem:[%s1282_s20] ss:$0 sm:$0xff]  ;;  %v328_v48 = vpack.c.bf16 %v327_v45, %v327_v45 }
  0x9b   : > { %825 = vrot.lane.b32.xlu0 %v1234_v11, %s1174_s12  ;;  %906 = vrot.lane.b32.xlu1 %v1237_v12, %s1175_s13  ;;  %v440_v12 = vpack.c.bf16 %v434_v46, %v434_v46  ;;  %v382_v46 = vsel %vm345_vm8, %v281_v39, 0  ;;  %v385_v23 = vsel %vm345_vm8, %v282_v43, 0  ;;  %v288_v47 = vmul.f32 %v1151_v44, %v283_v40 }
  0x9c   : > { %394 = vmatpush.bf16.msra.mxu2 %v382_v46  ;;  %407 = vmatpush.bf16.msra.mxu3 %v385_v23 }
  0x9d   : > { %455 = vrot.lane.b32.xlu2 %v440_v12, %s1176_s14  ;;  %v289_v49 = vpack.c.bf16 %v288_v47, %v288_v47 }
  0x9f   : > { %1087 = vmatmul.msk.bf16.vlgmr.msra.gmra.mxu2 %vm341_vm9, %v289_v49  ;;  %1088 = vmatmul.msk.bf16.vlgmr.msra.gmra.mxu3 %vm341_vm9, %v289_v49 }
  0xa0   : > { %v515_v56 = vld.sshfl [vmem:[#allocation1] sm:$0xff pattern:$0x75316420]  ;;  %v516_v57 = vld.sshfl [vmem:[#allocation1 + $0x8] sm:$0xff pattern:$0x75316420] }
  0xa1   : > { %593 = vst [vmem:[#allocation1] ss:$2 sm:$0xff] %v589_v51  ;;  %v517_v58 = vld.sshfl [vmem:[#allocation1 + $0x10] sm:$0xff pattern:$0x75316420]  ;;  %v522_v61 = vpack.c.bf16 %v516_v57, %v516_v57  ;;  %v521_v20 = vpack.c.bf16 %v515_v56, %v515_v56 }
  0xa2   : > { %595 = vst [vmem:[#allocation1 + $0x10] ss:$2 sm:$0xff] %v590_v52  ;;  %v523_v62 = vpack.c.bf16 %v517_v58, %v517_v58  ;;  %v1090_v56 = vld [vmem:[%s1399_s1 + $0x10] sm:$0xff] }
  0xa3   : > { %457 = vrot.lane.b32.xlu0 %v441_v54, %s1176_s14  ;;  %459 = vrot.lane.b32.xlu1 %v442_v55, %s1176_s14  ;;  %v1152_v54 = vld [vmem:[%s1282_s20 + $0x2] ss:$0 sm:$0xff] }
  0xa4   : > { %v450_v58 = vmul.f32 %v1152_v54, %v1090_v56 }
  0xa5   : > { %536 = vrot.lane.b32.xlu2 %v521_v20, %s1177_s21 }
  0xa6   : > { %v451_v2 = vpack.c.bf16 %v450_v58, %v450_v58 }
  0xa8   : > { %v596_v63 = vld.sshfl [vmem:[#allocation1] sm:$0xff pattern:$0x75316420]  ;;  %v597_v0 = vld.sshfl [vmem:[#allocation1 + $0x8] sm:$0xff pattern:$0x75316420] }
  0xa9   : > { %674 = vst [vmem:[#allocation1] ss:$2 sm:$0xff] %v670_v60  ;;  %v603_v1 = vpack.c.bf16 %v597_v0, %v597_v0  ;;  %v598_v5 = vld.sshfl [vmem:[#allocation1 + $0x10] sm:$0xff pattern:$0x75316420]  ;;  %v602_v28 = vpack.c.bf16 %v596_v63, %v596_v63 }
  0xaa   : > { %v604_v6 = vpack.c.bf16 %v598_v5, %v598_v5  ;;  %676 = vst [vmem:[#allocation1 + $0x10] ss:$2 sm:$0xff] %v671_v3  ;;  %v1094_v3 = vld [vmem:[%s1399_s1 + $0x18] sm:$0xff] }
  0xab   : > { %538 = vrot.lane.b32.xlu0 %v522_v61, %s1177_s21  ;;  %540 = vrot.lane.b32.xlu1 %v523_v62, %s1177_s21 }
  0xad   : > { %617 = vrot.lane.b32.xlu2 %v602_v28, %s1178_s22 }
  0xb0   : > { %v677_v10 = vld.sshfl [vmem:[#allocation1] sm:$0xff pattern:$0x75316420]  ;;  %v678_v11 = vld.sshfl [vmem:[#allocation1 + $0x8] sm:$0xff pattern:$0x75316420] }
  0xb1   : > { %v684_v13 = vpack.c.bf16 %v678_v11, %v678_v11  ;;  %755 = vst [vmem:[#allocation1] ss:$2 sm:$0xff] %v751_v8  ;;  %v679_v14 = vld.sshfl [vmem:[#allocation1 + $0x10] sm:$0xff pattern:$0x75316420]  ;;  %v683_v29 = vpack.c.bf16 %v677_v10, %v677_v10 }
  0xb2   : > { %v685_v16 = vpack.c.bf16 %v679_v14, %v679_v14  ;;  %757 = vst [vmem:[#allocation1 + $0x10] ss:$2 sm:$0xff] %v752_v9 }
  0xb3   : > { %619 = vrot.lane.b32.xlu0 %v603_v1, %s1178_s22  ;;  %621 = vrot.lane.b32.xlu1 %v604_v6, %s1178_s22  ;;  %v1153_v1 = vld [vmem:[%s1282_s20 + $0x3] ss:$0 sm:$0xff] }
  0xb4   : > { %v531_v9 = vmul.f32 %v1153_v1, %v1094_v3  ;;  %v1157_v1 = vld [vmem:[%s1282_s20 + $0x7] ss:$0 sm:$0xff] }
  0xb5   : > { %698 = vrot.lane.b32.xlu2 %v683_v29, %s1179_s23 }
  0xb6   : > { %v532_v14 = vpack.c.bf16 %v531_v9, %v531_v9 }
  0xb8   : > { %v759_v21 = vld.sshfl [vmem:[#allocation1 + $0x8] sm:$0xff pattern:$0x75316420]  ;;  %v758_v30 = vld.sshfl [vmem:[#allocation1] sm:$0xff pattern:$0x75316420] }
  0xb9   : > { %v765_v25 = vpack.c.bf16 %v759_v21, %v759_v21  ;;  %v760_v26 = vld.sshfl [vmem:[#allocation1 + $0x10] sm:$0xff pattern:$0x75316420]  ;;  %v764_v31 = vpack.c.bf16 %v758_v30, %v758_v30 }
  0xba   : > { %v766_v27 = vpack.c.bf16 %v760_v26, %v760_v26 }
  0xbb   : > { %700 = vrot.lane.b32.xlu0 %v684_v13, %s1179_s23  ;;  %702 = vrot.lane.b32.xlu1 %v685_v16, %s1179_s23 }
  0xbd   : > { %779 = vrot.lane.b32.xlu2 %v764_v31, %s1180_s24 }
  0xc3   : > { %781 = vrot.lane.b32.xlu0 %v765_v25, %s1180_s24  ;;  %783 = vrot.lane.b32.xlu1 %v766_v27, %s1180_s24 }
  0xec   : > { %v337_v32 = vpop.permute.xlu2 %336 }
  0xf7   : > { %v456_v20 = vpop.permute.xlu2 %455 }
  0xff   : > { %v537_v31 = vpop.permute.xlu2 %536 }
 0x105   : > { %v335_v33 = vpop.permute.xlu1 %334  ;;  %v333_v34 = vpop.permute.xlu0 %332 }
 0x106   : > { %v339_v35 = vsel %vm338_vm7, %v333_v34, %v335_v33  ;;  %v340_v36 = vsel %vm338_vm7, %v335_v33, %v337_v32  ;;  %v1154_v34 = vld [vmem:[%s1282_s20 + $0x4] ss:$0 sm:$0xff] }
 0x107   : > { %v347_v41 = vsel %vm345_vm8, %v339_v35, 0  ;;  %v350_v42 = vsel %vm345_vm8, %v340_v36, 0  ;;  %v1098_v35 = vld [vmem:[%s1399_s1 + $0x20] sm:$0xff]  ;;  %v618_v38 = vpop.permute.xlu2 %617 }
 0x108   : > { %359 = vmatpush.bf16.msra.mxu0 %v347_v41  ;;  %372 = vmatpush.bf16.msra.mxu1 %v350_v42  ;;  %v612_v37 = vmul.f32 %v1154_v34, %v1098_v35 }
 0x10a   : > { %v613_v44 = vpack.c.bf16 %v612_v37, %v612_v37 }
 0x10b   : > { %1085 = vmatmul.msk.bf16.vlgmr.msra.gmra.mxu0 %vm341_vm9, %v328_v48  ;;  %1086 = vmatmul.msk.bf16.vlgmr.msra.gmra.mxu1 %vm341_vm9, %v328_v48 }
 0x10d   : > { %v826_v24 = vpop.permute.xlu0 %825  ;;  %v907_v50 = vpop.permute.xlu1 %906 }
 0x10e   : > { %v827_v51 = vrot.slane %v826_v24, 4  ;;  %v908_v57 = vrot.slane %v907_v50, 4 }
 0x10f   : > { %v699_v46 = vpop.permute.xlu2 %698 }
 0x110   : > { %v829_v52 = vsel %vm828_vm10, %v827_v51, %v826_v24  ;;  %v833_v53 = vmul.f32 %v827_v51, %v1256_v19  ;;  %v914_v61 = vmul.f32 %v908_v57, %v1256_v19  ;;  %v910_v63 = vsel %vm909_vm12, %v908_v57, %v907_v50 }
 0x111   : > { %v832_v55 = vmul.f32 %v829_v52, %v1246_v15  ;;  %v913_v5 = vmul.f32 %v910_v63, %v1246_v15  ;;  %v1156_v52 = vld [vmem:[%s1282_s20 + $0x6] ss:$0 sm:$0xff] }
 0x112   : > { %838 = vst [vmem:[#allocation1 + $0x10] ss:$2 sm:$0xff] %v833_v53  ;;  %v1106_v53 = vld [vmem:[%s1399_s1 + $0x30] sm:$0xff]  ;;  %v987_v63 = vld [vmem:[%s1400_s2] sm:$0xff] }
 0x113   : > { %836 = vst [vmem:[#allocation1] ss:$2 sm:$0xff] %v832_v55  ;;  %v774_v54 = vmul.f32 %v1156_v52, %v1106_v53 }
 0x115   : > { %v458_v59 = vpop.permute.xlu0 %457  ;;  %v460_v60 = vpop.permute.xlu1 %459 }
 0x116   : > { %v463_v62 = vsel %vm461_vm11, %v458_v59, %v460_v60  ;;  %v462_v25 = vsel %vm461_vm11, %v456_v20, %v458_v59 }
 0x117   : > { %v471_v0 = vsel %vm345_vm8, %v463_v62, 0  ;;  %v468_v30 = vsel %vm345_vm8, %v462_v25, 0  ;;  %v780_v55 = vpop.permute.xlu2 %779  ;;  %v775_v62 = vpack.c.bf16 %v774_v54, %v774_v54  ;;  %v1114_v25 = vld [vmem:[%s1399_s1 + $0x40] sm:$0xff] }
 0x118   : > { %493 = vmatpush.bf16.msrb.mxu1 %v471_v0  ;;  %480 = vmatpush.bf16.msrb.mxu0 %v468_v30  ;;  %v1183_v0 = vmov 0  }
 0x119   : > { %v841_v4 = vld.sshfl [vmem:[#allocation1 + $0x10] sm:$0xff pattern:$0x75316420]  ;;  %1148 = vset.pattern.permute.xlu2 %v1183_v0  ;;  %1149 = vset.pattern.permute.xlu0 %v1183_v0 }
 0x11a   : > { %v847_v6 = vpack.c.bf16 %v841_v4, %v841_v4  ;;  %919 = vst [vmem:[#allocation1 + $0x10] ss:$2 sm:$0xff] %v914_v61  ;;  %v840_v7 = vld.sshfl [vmem:[#allocation1 + $0x8] sm:$0xff pattern:$0x75316420] }
 0x11b   : > { %v846_v8 = vpack.c.bf16 %v840_v7, %v840_v7  ;;  %v839_v19 = vld.sshfl [vmem:[#allocation1] sm:$0xff pattern:$0x75316420]  ;;  %1093 = vmatmul.msk.bf16.vlgmr.msrb.gmra.mxu1 %vm341_vm9, %v451_v2  ;;  %1092 = vmatmul.msk.bf16.vlgmr.msrb.gmra.mxu0 %vm341_vm9, %v451_v2  ;;  %v1110_v2 = vld [vmem:[%s1399_s1 + $0x38] sm:$0xff] }
 0x11c   : > { %864 = vrot.lane.b32.xlu1 %v847_v6, %s1181_s8  ;;  %v845_v10 = vpack.c.bf16 %v839_v19, %v839_v19  ;;  %917 = vst [vmem:[#allocation1] ss:$2 sm:$0xff] %v913_v5  ;;  %v855_v5 = vmul.f32 %v1157_v1, %v1110_v2 }
 0x11d   : > { %862 = vrot.lane.b32.xlu0 %v846_v8, %s1181_s8  ;;  %v539_v11 = vpop.permute.xlu0 %538  ;;  %v541_v12 = vpop.permute.xlu1 %540 }
 0x11e   : > { %860 = vrot.lane.b32.xlu2 %v845_v10, %s1181_s8  ;;  %v544_v13 = vsel %vm542_vm13, %v539_v11, %v541_v12  ;;  %v543_v32 = vsel %vm542_vm13, %v537_v31, %v539_v11  ;;  %v856_v10 = vpack.c.bf16 %v855_v5, %v855_v5 }
 0x11f   : > { %v552_v15 = vsel %vm345_vm8, %v544_v13, 0  ;;  %v549_v33 = vsel %vm345_vm8, %v543_v32, 0 }
 0x120   : > { %574 = vmatpush.bf16.msrb.mxu3 %v552_v15  ;;  %561 = vmatpush.bf16.msrb.mxu2 %v549_v33 }
 0x121   : > { %v922_v16 = vld.sshfl [vmem:[#allocation1 + $0x10] sm:$0xff pattern:$0x75316420] }
 0x122   : > { %v928_v21 = vpack.c.bf16 %v922_v16, %v922_v16  ;;  %v396_v11 = vpop.f32.mrf.mxu2  ;;  %v409_v12 = vpop.f32.mrf.mxu3 }
 0x123   : > { %v921_v26 = vld.sshfl [vmem:[#allocation1 + $0x8] sm:$0xff pattern:$0x75316420]  ;;  %v920_v27 = vld.sshfl [vmem:[#allocation1] sm:$0xff pattern:$0x75316420]  ;;  %1097 = vmatmul.msk.bf16.vlgmr.msrb.gmra.mxu3 %vm341_vm9, %v532_v14  ;;  %1096 = vmatmul.msk.bf16.vlgmr.msrb.gmra.mxu2 %vm341_vm9, %v532_v14 }
 0x124   : > { %945 = vrot.lane.b32.xlu1 %v928_v21, %s1182_s9  ;;  %v927_v28 = vpack.c.bf16 %v921_v26, %v921_v26  ;;  %v926_v29 = vpack.c.bf16 %v920_v27, %v920_v27  ;;  %v1158_v21 = vld [vmem:[%s1282_s20 + $0x8] ss:$0 sm:$0xff] }
 0x125   : > { %v620_v36 = vpop.permute.xlu0 %619  ;;  %v622_v39 = vpop.permute.xlu1 %621  ;;  %v936_v27 = vmul.f32 %v1158_v21, %v1114_v25 }
 0x126   : > { %943 = vrot.lane.b32.xlu0 %v927_v28, %s1182_s9  ;;  %941 = vrot.lane.b32.xlu2 %v926_v29, %s1182_s9  ;;  %v624_v40 = vsel %vm259_vm14, %v618_v38, %v620_v36  ;;  %v625_v41 = vsel %vm259_vm14, %v620_v36, %v622_v39 }
 0x127   : > { %v630_v42 = vsel %vm345_vm8, %v624_v40, 0  ;;  %v633_v43 = vsel %vm345_vm8, %v625_v41, 0  ;;  %v937_v37 = vpack.c.bf16 %v936_v27, %v936_v27 }
 0x128   : > { %642 = vmatpush.bf16.msra.mxu0 %v630_v42  ;;  %655 = vmatpush.bf16.msra.mxu1 %v633_v43 }
 0x12a   : > { %v398_v30 = vpop.f32.mrf.mxu2  ;;  %v411_v34 = vpop.f32.mrf.mxu3 }
 0x12b   : > { %1101 = vmatmul.msk.bf16.vlgmr.msra.gmra.mxu1 %vm341_vm9, %v613_v44  ;;  %1100 = vmatmul.msk.bf16.vlgmr.msra.gmra.mxu0 %vm341_vm9, %v613_v44 }
 0x12c   : > { %255 = vrot.lane.b32.xlu1 %v1254_v18, %s1178_s22  ;;  %v1155_v18 = vld [vmem:[%s1282_s20 + $0x5] ss:$0 sm:$0xff]  ;;  %s1120_s20 = sshll.u32 %s1405_s19, 5 }
 0x12d   : > { %v701_v23 = vpop.permute.xlu0 %700  ;;  %v703_v48 = vpop.permute.xlu1 %702  ;;  %s241_s27 = scalar_lea.vmem %s1403_s5, %s1120_s20 }
 0x12e   : > { %253 = vrot.lane.b32.xlu0 %v1252_v17, %s1178_s22  ;;  %v1102_v17 = vld [vmem:[%s1399_s1 + $0x28] sm:$0xff]  ;;  %v705_v47 = vsel %vm704_vm15, %v699_v46, %v701_v23  ;;  %v706_v24 = vsel %vm704_vm15, %v701_v23, %v703_v48  ;;  %990 = vperm.xlu2 %1148, %v987_v63  }
 0x12f   : > { %v693_v45 = vmul.f32 %v1155_v18, %v1102_v17  ;;  %v711_v49 = vsel %vm345_vm8, %v705_v47, 0  ;;  %v714_v51 = vsel %vm345_vm8, %v706_v24, 0 }
 0x130   : > { %723 = vmatpush.bf16.msra.mxu2 %v711_v49  ;;  %736 = vmatpush.bf16.msra.mxu3 %v714_v51 }
 0x131   : > { %v694_v50 = vpack.c.bf16 %v693_v45, %v693_v45 }
 0x133   : > { %1104 = vmatmul.msk.bf16.vlgmr.msra.gmra.mxu2 %vm341_vm9, %v694_v50  ;;  %1105 = vmatmul.msk.bf16.vlgmr.msra.gmra.mxu3 %vm341_vm9, %v694_v50 }
 0x135   : > { %v782_v56 = vpop.permute.xlu0 %781  ;;  %v784_v58 = vpop.permute.xlu1 %783 }
 0x136   : > { %v786_v57 = vsel %vm785_vm0, %v780_v55, %v782_v56  ;;  %v787_v60 = vsel %vm785_vm0, %v782_v56, %v784_v58  ;;  %257 = vrot.lane.b32.xlu2 %v1259_v22, %s1178_s22 }
 0x137   : > { %v792_v59 = vsel %vm345_vm8, %v786_v57, 0  ;;  %v795_v61 = vsel %vm345_vm8, %v787_v60, 0 }
 0x138   : > { %804 = vmatpush.bf16.msrb.mxu0 %v792_v59  ;;  %817 = vmatpush.bf16.msrb.mxu1 %v795_v61 }
 0x13b   : > { %1108 = vmatmul.msk.bf16.vlgmr.msrb.gmra.mxu0 %vm341_vm9, %v775_v62  ;;  %1109 = vmatmul.msk.bf16.vlgmr.msrb.gmra.mxu1 %vm341_vm9, %v775_v62 }
 0x178   : > { %v861_v6 = vpop.permute.xlu2 %860 }
 0x180   : > { %v942_v28 = vpop.permute.xlu2 %941 }
 0x188   : > { %v361_v3 = vpop.f32.mrf.mxu0  ;;  %v374_v4 = vpop.f32.mrf.mxu1 }
 0x189   : > { %v397_v16 = vadd.f32 %v396_v11, %v361_v3  ;;  %v410_v20 = vadd.f32 %v409_v12, %v374_v4  ;;  %v991_v63 = vpop.permute.xlu2 %990 }
 0x18e   : > { %v865_v7 = vpop.permute.xlu1 %864 }
 0x18f   : > { %v863_v8 = vpop.permute.xlu0 %862 }
 0x190   : > { %v867_v19 = vsel %vm866_vm1, %v861_v6, %v863_v8  ;;  %v868_v9 = vsel %vm866_vm1, %v863_v8, %v865_v7  ;;  %v363_v15 = vpop.f32.mrf.mxu0  ;;  %v376_v14 = vpop.f32.mrf.mxu1 }
 0x191   : > { %v873_v13 = vsel %vm345_vm8, %v867_v19, 0  ;;  %v876_v22 = vsel %vm345_vm8, %v868_v9, 0  ;;  %v258_v1 = vpop.permute.xlu2 %257 }
 0x192   : > { %885 = vmatpush.bf16.msrb.mxu2 %v873_v13  ;;  %898 = vmatpush.bf16.msrb.mxu3 %v876_v22 }
 0x195   : > { %1112 = vmatmul.msk.bf16.vlgmr.msrb.gmra.mxu2 %vm341_vm9, %v856_v10  ;;  %1113 = vmatmul.msk.bf16.vlgmr.msrb.gmra.mxu3 %vm341_vm9, %v856_v10 }
 0x196   : > { %v946_v26 = vpop.permute.xlu1 %945 }
 0x198   : > { %v944_v29 = vpop.permute.xlu0 %943  ;;  %v495_v33 = vpop.f32.mrf.mxu1 }
 0x199   : > { %v948_v31 = vsel %vm947_vm2, %v942_v28, %v944_v29  ;;  %v949_v32 = vsel %vm947_vm2, %v944_v29, %v946_v26  ;;  %v500_v38 = vadd.f32 %v495_v33, %v410_v20  ;;  %v482_v40 = vpop.f32.mrf.mxu0 }
 0x19a   : > { %v954_v35 = vsel %vm345_vm8, %v948_v31, 0  ;;  %v957_v36 = vsel %vm345_vm8, %v949_v32, 0  ;;  %v499_v41 = vadd.f32 %v482_v40, %v397_v16 }
 0x19b   : > { %966 = vmatpush.bf16.msra.mxu0 %v954_v35  ;;  %979 = vmatpush.bf16.msra.mxu1 %v957_v36 }
 0x19e   : > { %1116 = vmatmul.msk.bf16.vlgmr.msra.gmra.mxu0 %vm341_vm9, %v937_v37  ;;  %1117 = vmatmul.msk.bf16.vlgmr.msra.gmra.mxu1 %vm341_vm9, %v937_v37  ;;  %v256_v0 = vpop.permute.xlu1 %255 }
 0x19f   : > { %v261_v2 = vsel %vm259_vm14, %v256_v0, %v258_v1 }
 0x1a0   : > { %v497_v39 = vpop.f32.mrf.mxu1  ;;  %v254_v3 = vpop.permute.xlu0 %253  ;;  %265 = vst [vmem:[%s241_s27 + $0x8] sm:$0xf] %v261_v2 }
 0x1a1   : > { %v484_v44 = vpop.f32.mrf.mxu0  ;;  %v260_v4 = vsel %vm259_vm14, %v254_v3, %v256_v0 }
 0x1a2   : > { %264 = vst [vmem:[%s241_s27] sm:$0xf] %v260_v4 }
 0x1a6   : > { %v576_v42 = vpop.f32.mrf.mxu3  ;;  %v563_v17 = vpop.f32.mrf.mxu2 }
 0x1a7   : > { %v581_v43 = vadd.f32 %v576_v42, %v500_v38  ;;  %v580_v45 = vadd.f32 %v563_v17, %v499_v41 }
 0x1a8   : > { %v657_v46 = vpop.f32.mrf.mxu1 }
 0x1a9   : > { %v644_v23 = vpop.f32.mrf.mxu0  ;;  %v662_v47 = vadd.f32 %v657_v46, %v581_v43 }
 0x1aa   : > { %v661_v48 = vadd.f32 %v644_v23, %v580_v45 }
 0x1ae   : > { %v578_v18 = vpop.f32.mrf.mxu3  ;;  %v565_v49 = vpop.f32.mrf.mxu2 }
 0x1b0   : > { %v659_v24 = vpop.f32.mrf.mxu1 }
 0x1b1   : > { %v646_v50 = vpop.f32.mrf.mxu0 }
 0x1b6   : > { %v725_v51 = vpop.f32.mrf.mxu2  ;;  %v738_v53 = vpop.f32.mrf.mxu3 }
 0x1b7   : > { %v742_v52 = vadd.f32 %v725_v51, %v661_v48  ;;  %v743_v54 = vadd.f32 %v738_v53, %v662_v47 }
 0x1b8   : > { %v819_v56 = vpop.f32.mrf.mxu1 }
 0x1b9   : > { %v806_v55 = vpop.f32.mrf.mxu0  ;;  %v824_v58 = vadd.f32 %v819_v56, %v743_v54 }
 0x1ba   : > { %v823_v57 = vadd.f32 %v806_v55, %v742_v52 }
 0x1be   : > { %v727_v59 = vpop.f32.mrf.mxu2  ;;  %v740_v60 = vpop.f32.mrf.mxu3 }
 0x1c0   : > { %v821_v62 = vpop.f32.mrf.mxu1 }
 0x1c1   : > { %v808_v61 = vpop.f32.mrf.mxu0 }
 0x218   : > { %v887_v5 = vpop.f32.mrf.mxu2  ;;  %v900_v6 = vpop.f32.mrf.mxu3 }
 0x219   : > { %v904_v7 = vadd.f32 %v887_v5, %v823_v57  ;;  %v905_v8 = vadd.f32 %v900_v6, %v824_v58 }
 0x21b   : > { %v968_v19 = vpop.f32.mrf.mxu0  ;;  %v981_v9 = vpop.f32.mrf.mxu1 }
 0x21c   : > { %v985_v10 = vadd.f32 %v968_v19, %v904_v7  ;;  %v986_v11 = vadd.f32 %v981_v9, %v905_v8 }
 0x21e   : > { %v993_v12 = vadd.f32 %v991_v63, %v985_v10  ;;  %v994_v13 = vadd.f32 %v991_v63, %v986_v11 }
 0x220   : > { %v995_v22 = vmax.f32 %v993_v12, 0.0  ;;  %v996_v15 = vmax.f32 %v994_v13, 0.0  ;;  %v889_v14 = vpop.f32.mrf.mxu2  ;;  %v902_v16 = vpop.f32.mrf.mxu3 }
 0x222   : > { %v999_v20 = vrot.slane %v995_v22, 4  ;;  %v1000_v21 = vrot.slane %v996_v15, 4 }
 0x223   : > { %v970_v25 = vpop.f32.mrf.mxu0  ;;  %v983_v26 = vpop.f32.mrf.mxu1 }
 0x224   : > { %1003 = vst [vmem:[%s241_s27] sm:$0xf0] %v999_v20 }
 0x225   : > { %1004 = vst [vmem:[%s241_s27 + $0x8] sm:$0xf0] %v1000_v21 }
 0x226   : > { %1005 = vst [vmem:[%s241_s27 + $0x10] sm:$0xf] %v999_v20 }
 0x227   : > { %1006 = vst [vmem:[%s241_s27 + $0x18] sm:$0xf] %v1000_v21 }
 0x228 PF: > { %s15_s18 = sadd.s32 1, %s1165_s18  }
 0x229   : > { %p12_p4 = scmp.ge.s32.totalorder %s15_s18, 4  }
 0x22b   :  { %14 = sbr.rel (!%p12_p4) target bundleno = 1 (0x1), region = 100 }

</bundles_post_ra>
